<compile_context>
chip_gen: v7x
topology: tpu7x:2x2x1
jax: 0.10.0
libtpu: 0.0.40
codegen_flags: <defaults>
</compile_context>

<pallas_src>
import jax
import jax.numpy as jnp
from jax.experimental import pallas as pl
from jax.experimental.pallas import tpu as pltpu

LANE = 128


# ----------------------------------------------------------------------------
# Small helpers
# ----------------------------------------------------------------------------
def _round_up(v, m):
    return ((v + m - 1) // m) * m


def _vmem_limit_bytes():
    """Per-generation scoped-VMEM cap (v7x has only 64 MiB per TensorCore)."""
    try:
        cap = pltpu.get_tpu_info().vmem_capacity_bytes
    except Exception:
        cap = 64 * 1024 * 1024                      # most restrictive (v7x)
    return max(32 * 1024 * 1024,
               min(cap - 8 * 1024 * 1024, 100 * 1024 * 1024))


def _choose_row_tile(n):
    """Pick (tm, n_pad): prefer 512-row tiles and pad N up to a tile multiple.

    Keeps >= 2 row tiles (v7x: both TensorCores busy) and at most one tile of
    zero padding (padding is exact for the matmul but wastes HBM/compute).
    """
    for tm in (512, 256, 128):
        n_pad = _round_up(n, tm)
        if n_pad // tm >= 2 and (n_pad - n) <= tm:
            return tm, n_pad
    return 128, max(_round_up(n, 128), 256)


def _choose_k_tile(n_pad):
    # >= 256 contraction depth matches the v6e/v7x 256-wide MXU.
    return 256 if n_pad % 256 == 0 else 128


def _pad2d(a, rows, cols, dtype):
    out = jnp.zeros((rows, cols), dtype)
    return out.at[: a.shape[0], : a.shape[1]].set(a.astype(dtype))


def _resident_vmem_bytes(tm, n_pad, ci_pad, co_pad, out_bytes, fuse_w):
    """Conservative VMEM estimate of the resident-X aggregation pallas_call."""
    adj = 2 * tm * n_pad * 2                    # double-buffered bf16 A strip
    x = 2 * n_pad * ci_pad * 2                  # resident X (2 buffers alloc'd)
    w = (2 * ci_pad * co_pad * 2) if fuse_w else 0
    bias = 2 * co_pad * 4
    out = 2 * tm * co_pad * out_bytes
    tmp = tm * ci_pad * 4 + tm * co_pad * 4     # f32 matmul intermediates
    return adj + x + w + bias + out + tmp


# ----------------------------------------------------------------------------
# Pallas kernels
# ----------------------------------------------------------------------------
def _project_kernel(x_ref, w_ref, o_ref):
    # xw = x @ w (row tile), MXU-native bf16 inputs, f32 accumulate.
    o_ref[...] = jnp.dot(
        x_ref[...], w_ref[...], preferred_element_type=jnp.float32
    ).astype(o_ref.dtype)


def _epilogue(y, b, apply_relu, apply_log_softmax, valid_cols):
    """f32 elementwise finalize: +bias [+relu | +masked log_softmax]."""
    y = y + b
    if apply_relu:
        y = jnp.maximum(y, 0.0)
    if apply_log_softmax:
        col = jax.lax.broadcasted_iota(jnp.int32, y.shape, 1)
        mask = col < valid_cols                 # ignore padded channels
        m = jnp.max(jnp.where(mask, y, -jnp.inf), axis=-1, keepdims=True)
        s = y - m
        z = jnp.sum(jnp.exp(jnp.where(mask, s, -jnp.inf)),
                    axis=-1, keepdims=True)
        y = s - jnp.log(z)
    return y


def _make_agg_resident_kernel(fuse_w, apply_relu, apply_log_softmax, valid_cols):
    """One (tm, N) @ (N, C) dot per row tile; X is VMEM-resident."""

    def kernel(*refs):
        if fuse_w:
            adj_ref, x_ref, w_ref, b_ref, o_ref = refs
        else:
            adj_ref, x_ref, b_ref, o_ref = refs
            w_ref = None
        # Full contraction in one MXU pass; A_hat is the only HBM stream.
        y = jnp.dot(adj_ref[...], x_ref[...],
                    preferred_element_type=jnp.float32)
        if fuse_w:
            # Keep the LHS in f32 (no bf16 truncation of the aggregate); the
            # kernel is HBM-bound so the slower f32 MXU pass is hidden.
            y = jnp.dot(y, w_ref[...].astype(jnp.float32),
                        preferred_element_type=jnp.float32)
        o_ref[...] = _epilogue(y, b_ref[...], apply_relu, apply_log_softmax,
                               valid_cols).astype(o_ref.dtype)

    return kernel


def _make_agg_streamed_kernel(fuse_w, apply_relu, apply_log_softmax, valid_cols):
    """Fallback: acc += A_tile @ X_tile over k, finalize at k == last."""

    def kernel(*refs):
        if fuse_w:
            adj_ref, x_ref, w_ref, b_ref, o_ref, acc_ref = refs
        else:
            adj_ref, x_ref, b_ref, o_ref, acc_ref = refs
            w_ref = None

        k = pl.program_id(1)

        @pl.when(k == 0)
        def _init():
            acc_ref[...] = jnp.zeros_like(acc_ref)

        acc_ref[...] += jnp.dot(
            adj_ref[...], x_ref[...], preferred_element_type=jnp.float32
        )

        @pl.when(k == pl.num_programs(1) - 1)
        def _finalize():
            y = acc_ref[...]
            if fuse_w:
                y = jnp.dot(y, w_ref[...].astype(jnp.float32),
                            preferred_element_type=jnp.float32)
            o_ref[...] = _epilogue(y, b_ref[...], apply_relu,
                                   apply_log_softmax,
                                   valid_cols).astype(o_ref.dtype)

    return kernel


# ----------------------------------------------------------------------------
# pallas_call wrappers
# ----------------------------------------------------------------------------
def _project(x, w, vmem_limit):
    """xw = x @ w with its own (large) row tile, independent of the agg tm."""
    n_pad, ci_pad = x.shape
    co_pad = w.shape[1]
    tm = next(t for t in (1024, 512, 256, 128)
              if n_pad % t == 0 and n_pad // t >= 2)
    return pl.pallas_call(
        _project_kernel,
        out_shape=jax.ShapeDtypeStruct((n_pad, co_pad), jnp.bfloat16),
        grid_spec=pltpu.PrefetchScalarGridSpec(
            num_scalar_prefetch=0,
            grid=(n_pad // tm,),
            in_specs=[
                pl.BlockSpec((tm, ci_pad), lambda i: (i, 0)),
                pl.BlockSpec((ci_pad, co_pad), lambda i: (0, 0)),
            ],
            out_specs=pl.BlockSpec((tm, co_pad), lambda i: (i, 0)),
        ),
        compiler_params=pltpu.CompilerParams(
            dimension_semantics=("parallel",),
            vmem_limit_bytes=vmem_limit,
        ),
    )(x, w)


def _aggregate_resident(adj, x, w, b, tm, *, apply_relu, apply_log_softmax,
                        valid_cols, out_dtype, vmem_limit):
    """out = finalize(A_hat @ x) with X held resident in VMEM (no k axis)."""
    n_pad = adj.shape[0]
    ci_pad = x.shape[1]
    co_pad = b.shape[1]
    fuse_w = w is not None

    in_specs = [
        pl.BlockSpec((tm, n_pad), lambda i: (i, 0)),      # streamed A row strip
        pl.BlockSpec((n_pad, ci_pad), lambda i: (0, 0)),  # X: constant block
    ]                                                     # index -> fetched once
    args = [adj, x]
    if fuse_w:
        in_specs.append(pl.BlockSpec((ci_pad, co_pad), lambda i: (0, 0)))
        args.append(w)
    in_specs.append(pl.BlockSpec((1, co_pad), lambda i: (0, 0)))
    args.append(b)

    kernel = _make_agg_resident_kernel(fuse_w, apply_relu, apply_log_softmax,
                                       valid_cols)
    return pl.pallas_call(
        kernel,
        out_shape=jax.ShapeDtypeStruct((n_pad, co_pad), out_dtype),
        grid_spec=pltpu.PrefetchScalarGridSpec(
            num_scalar_prefetch=0,
            grid=(n_pad // tm,),
            in_specs=in_specs,
            out_specs=pl.BlockSpec((tm, co_pad), lambda i: (i, 0)),
        ),
        compiler_params=pltpu.CompilerParams(
            dimension_semantics=("parallel",),
            vmem_limit_bytes=vmem_limit,
        ),
    )(*args)


def _aggregate_streamed(adj, x, w, b, tm, tk, *, apply_relu, apply_log_softmax,
                        valid_cols, out_dtype, vmem_limit):
    """Fallback for large graphs: X re-streamed over a k grid axis."""
    n_pad = adj.shape[0]
    ci_pad = x.shape[1]
    co_pad = b.shape[1]
    fuse_w = w is not None
    acc_cols = ci_pad if fuse_w else co_pad

    in_specs = [
        pl.BlockSpec((tm, tk), lambda i, k: (i, k)),       # A_hat tile
        pl.BlockSpec((tk, ci_pad), lambda i, k: (k, 0)),   # activation tile
    ]
    args = [adj, x]
    if fuse_w:
        in_specs.append(pl.BlockSpec((ci_pad, co_pad), lambda i, k: (0, 0)))
        args.append(w)
    in_specs.append(pl.BlockSpec((1, co_pad), lambda i, k: (0, 0)))
    args.append(b)

    kernel = _make_agg_streamed_kernel(fuse_w, apply_relu, apply_log_softmax,
                                       valid_cols)
    return pl.pallas_call(
        kernel,
        out_shape=jax.ShapeDtypeStruct((n_pad, co_pad), out_dtype),
        grid_spec=pltpu.PrefetchScalarGridSpec(
            num_scalar_prefetch=0,
            grid=(n_pad // tm, n_pad // tk),
            in_specs=in_specs,
            out_specs=pl.BlockSpec((tm, co_pad), lambda i, k: (i, 0)),
            scratch_shapes=[pltpu.VMEM((tm, acc_cols), jnp.float32)],
        ),
        compiler_params=pltpu.CompilerParams(
            dimension_semantics=("parallel", "arbitrary"),
            vmem_limit_bytes=vmem_limit,
        ),
    )(*args)


# ----------------------------------------------------------------------------
# Model glue (graph build, params, forward)
# ----------------------------------------------------------------------------
def build_normalized_adjacency(src, dst, num_nodes):
    """Dense A_hat = D_in^{-1/2} (A + I) D_out^{-1/2}, messages flow src -> dst.

    Matches dgl.add_self_loop + GraphConv(norm='both') on a dense graph.
    """
    a = jnp.zeros((num_nodes, num_nodes), jnp.float32)
    a = a.at[dst, src].add(1.0)                       # A[dst, src]
    a = a + jnp.eye(num_nodes, dtype=jnp.float32)     # self-loops
    d_out = jnp.sum(a, axis=0)                        # out-degree of src (cols)
    d_in = jnp.sum(a, axis=1)                         # in-degree of dst (rows)
    inv_sqrt_out = jnp.where(d_out > 0, 1.0 / jnp.sqrt(d_out), 0.0)
    inv_sqrt_in = jnp.where(d_in > 0, 1.0 / jnp.sqrt(d_in), 0.0)
    return inv_sqrt_in[:, None] * a * inv_sqrt_out[None, :]


def xavier_uniform(key, fan_in, fan_out):
    bound = (6.0 / (fan_in + fan_out)) ** 0.5
    return jax.random.uniform(key, (fan_in, fan_out), jnp.float32, -bound, bound)


def gcn_dgl_forward(x, adj_hats, weights, biases):
    """Replicates GCN_DGL.forward (eval mode).

    x:        (N, C_in) f32 node features
    adj_hats: list of (N, N) f32 dense normalized adjacencies (one per layer;
              identical objects share one padded bf16 HBM buffer)
    weights:  list of (C_in_i, C_out_i) f32
    biases:   list of (C_out_i,) f32
    """
    num_layers = len(weights)
    n = x.shape[0]
    tm, n_pad = _choose_row_tile(n)
    tk = _choose_k_tile(n_pad)
    out_channels = weights[-1].shape[1]

    vmem_limit = _vmem_limit_bytes()
    vmem_budget = int(vmem_limit * 0.75)   # headroom for compiler scratch

    # Pad the node axis and cast the HBM-heavy adjacency to bf16 once per
    # DISTINCT adjacency object (reused across layers sharing one graph).
    adj_cache = {}
    adjs = []
    for a in adj_hats:
        key = id(a)
        if key not in adj_cache:
            adj_cache[key] = _pad2d(a, n_pad, n_pad, jnp.bfloat16)
        adjs.append(adj_cache[key])

    h = _pad2d(x, n_pad, _round_up(x.shape[1], LANE), jnp.bfloat16)

    for i in range(num_layers):
        w, b = weights[i], biases[i]
        ci, co = w.shape
        ci_pad, co_pad = _round_up(ci, LANE), _round_up(co, LANE)
        w_p = _pad2d(w, ci_pad, co_pad, jnp.bfloat16)
        b_p = jnp.zeros((1, co_pad), jnp.float32).at[0, :co].set(
            jnp.asarray(b, jnp.float32).reshape(-1))

        last = i == num_layers - 1
        out_dtype = jnp.float32 if last else jnp.bfloat16
        out_bytes = 4 if last else 2

        # Project-first shrinks the aggregation feature width; at equal widths
        # fusing W avoids an extra HBM round trip of X @ W.
        project_first = ci_pad > co_pad
        agg_ci = co_pad if project_first else ci_pad
        resident = _resident_vmem_bytes(
            tm, n_pad, agg_ci, co_pad, out_bytes,
            fuse_w=not project_first) <= vmem_budget
        if (not resident) and (not project_first) and ci_pad >= co_pad:
            # Streamed path: keep the f32 accumulator as narrow as possible
            # (v5e store pressure) -> prefer project-first when widths tie.
            project_first = True

        if project_first:
            h = _project(h, w_p, vmem_limit)
            w_arg = None
        else:
            w_arg = w_p

        if resident:
            h = _aggregate_resident(
                adjs[i], h, w_arg, b_p, tm,
                apply_relu=not last, apply_log_softmax=last,
                valid_cols=co, out_dtype=out_dtype, vmem_limit=vmem_limit)
        else:
            h = _aggregate_streamed(
                adjs[i], h, w_arg, b_p, tm, tk,
                apply_relu=not last, apply_log_softmax=last,
                valid_cols=co, out_dtype=out_dtype, vmem_limit=vmem_limit)
        # dropout(p=0.5): identity in eval mode (see TODO above).

    return h[:n, :out_channels]


def reference_forward(x, adj_hats, weights, biases):
    """Pure-JAX f32 reference of the same forward pass."""
    h = x
    n_layers = len(weights)
    for i in range(n_layers):
        h = adj_hats[i] @ (h @ weights[i]) + biases[i][None, :]
        if i != n_layers - 1:
            h = jnp.maximum(h, 0.0)
    return jax.nn.log_softmax(h, axis=-1)


# ----------------------------------------------------------------------------
# Example run
# ----------------------------------------------------------------------------
if __name__ == "__main__":
    key = jax.random.PRNGKey(0)

    num_nodes = 640          # pads to 1024 -> 2 row tiles of tm = 512
    in_channels = 200        # pads to 256 (> 128) -> exercises project-first path
    hidden_channels = 128    # module default; already lane-dense
    out_channels = 10        # pads to 128
    num_layers = 2
    num_edges = 4000

    keys = jax.random.split(key, 8)
    x = jax.random.normal(keys[0], (num_nodes, in_channels), jnp.float32)

    # One sampled edge_index per layer (mirrors the `adjs` list in forward()).
    adj_hats = []
    for li in range(num_layers):
        src = jax.random.randint(keys[1 + 2 * li], (num_edges,), 0, num_nodes)
        dst = jax.random.randint(keys[2 + 2 * li], (num_edges,), 0, num_nodes)
        adj_hats.append(build_normalized_adjacency(src, dst, num_nodes))

    # GraphConv parameters (xavier-uniform weights; biases exercise the add path).
    w0 = xavier_uniform(keys[5], in_channels, hidden_channels)
    w1 = xavier_uniform(keys[6], hidden_channels, out_channels)
    b0 = 0.1 * jax.random.normal(keys[7], (hidden_channels,), jnp.float32)
    b1 = jnp.zeros((out_channels,), jnp.float32)
    weights = [w0, w1]
    biases = [b0, b1]

    out = gcn_dgl_forward(x, adj_hats, weights, biases)
    out = jax.block_until_ready(out)

    assert out.shape == (num_nodes, out_channels)
    # log_softmax rows must exponentiate-sum to 1.
    assert bool(jnp.allclose(jnp.sum(jnp.exp(out), axis=-1), 1.0, atol=1e-3))
    # Loose check vs. an f32 pure-JAX reference (kernel runs bf16 inputs / f32 accum).
    ref = reference_forward(x, adj_hats, weights, biases)
    assert bool(jnp.max(jnp.abs(out - ref)) < 0.25)

    print("KERNEL_OK")
</pallas_src>

<mosaic_0001>
module attributes {stable_mosaic.version = 11 : i64} {
  func.func @_project_kernel(%arg0: i32, %arg1: memref<512x256xbf16, #tpu.memory_space<vmem>>, %arg2: memref<256x128xbf16, #tpu.memory_space<vmem>>, %arg3: memref<512x128xbf16, #tpu.memory_space<vmem>>) attributes {dimension_semantics = [#tpu.dimension_semantics<parallel>], iteration_bounds = array<i64: 2>, scalar_prefetch = 0 : i64, scratch_operands = 0 : i64, tpu.core_type = #tpu.core_type<tc>, window_params = [{transform_indices = @transform_0, window_bounds = array<i64: 512, 256>}, {pipeline_mode = #tpu.pipeline_mode<synchronous>, transform_indices = @transform_1, window_bounds = array<i64: 256, 128>}, {transform_indices = @transform_2, window_bounds = array<i64: 512, 128>}]} {
    %c0 = arith.constant 0 : index
    %c0_0 = arith.constant 0 : index
    %0 = vector.load %arg1[%c0, %c0_0] : memref<512x256xbf16, #tpu.memory_space<vmem>>, vector<512x256xbf16>
    %c0_1 = arith.constant 0 : index
    %c0_2 = arith.constant 0 : index
    %1 = vector.load %arg2[%c0_1, %c0_2] : memref<256x128xbf16, #tpu.memory_space<vmem>>, vector<256x128xbf16>
    %cst = arith.constant dense<0.000000e+00> : vector<512x128xf32>
    %2 = tpu.matmul %0, %1, %cst {dimension_numbers = #tpu.dot_dimension_numbers<[1], [0], [0], [1], [0, 0, 1, 1], [], []>} : vector<512x256xbf16>, vector<256x128xbf16>, vector<512x128xf32> -> vector<512x128xf32>
    %3 = arith.truncf %2 : vector<512x128xf32> to vector<512x128xbf16>
    %c0_3 = arith.constant 0 : index
    %c0_4 = arith.constant 0 : index
    %4 = vector.load %arg3[%c0_3, %c0_4] : memref<512x128xbf16, #tpu.memory_space<vmem>>, vector<512x128xbf16>
    tpu.vector_store %arg3[%c0_3, %c0_4], %3 {strides = array<i32>} : memref<512x128xbf16, #tpu.memory_space<vmem>>, vector<512x128xbf16>,
    return
  }
  func.func @transform_0(%arg0: i32) -> (i32, i32) {
    %c0_i32 = arith.constant 0 : i32
    %c0_i32_0 = arith.constant 0 : i32
    return %arg0, %c0_i32 : i32, i32
  }
  func.func @transform_1(%arg0: i32) -> (i32, i32) {
    %c0_i32 = arith.constant 0 : i32
    %c0_i32_0 = arith.constant 0 : i32
    %c0_i32_1 = arith.constant 0 : i32
    return %c0_i32, %c0_i32_0 : i32, i32
  }
  func.func @transform_2(%arg0: i32) -> (i32, i32) {
    %c0_i32 = arith.constant 0 : i32
    %c0_i32_0 = arith.constant 0 : i32
    return %arg0, %c0_i32 : i32, i32
  }
}

</mosaic_0001>

<bundles_post_ra>
// kernel: tpu_custom_call.1
= control target key start
LH: loop header
LB: loop body
LE: loop exit
PB: predicated region body
PF: predicated region fallthrough
CT: control target
= control target key end

     0   :  { %7 = vsyncpa [#allocation3], 0  ;;  %s2516_s0 = inlined_call_operand.hbm [shape: bf16[1024,256], index: 0, kind: input, shape index: {}]   ;;  %s2517_s1 = inlined_call_operand.hbm [shape: bf16[256,128], index: 1, kind: input, shape index: {}]   ;;  %s2518_s2 = inlined_call_operand.hbm [shape: bf16[1024,128], index: 2, kind: output, shape index: {}]  }
   0x1   :  { %9 = vsyncpa [#allocation3 + $0x1], 0 }
   0x2   :  { %10 = vsyncpa [#allocation6], 0 }
   0x3   :  { %11 = vsyncpa [#allocation4], 0 }
   0x4   :  { %13 = vsyncpa [#allocation4 + $0x1], 0  ;;  %s2181_s9 = smov 0   ;;  %s2183_s10 = smov 0  }
   0x5   :  { %s2185_s11 = smov 0   ;;  %s2187_s12 = smov 0  }
   0x6 LB: > { %s2202_s13 = sadd.s32 4294967295, %s2154_s12   ;;  %s1399_s14 = sadd.s32 4294967294, %s2154_s12   ;;  %s2154_s12 = sphi %s2187_s12, %s2538_s12   ;;  %s2150_s11 = sphi %s2185_s11, %s2537_s11   ;;  %s2146_s10 = sphi %s2183_s10, %s2536_s10   ;;  %s2142_s9 = sphi %s2181_s9, %s2535_s9  }
   0x7   : > { %p39_p0 = scmp.ne.s32.totalorder %s2146_s10, %s2142_s9  ;;  %p2519_p1 = scmp.eq.s32.totalorder %s2202_s13, 0 }
   0x8   : > { %p90_p3 = scmp.eq.s32.totalorder %s1399_s14, 1  ;;  %p1400_p5 = scmp.ge.s32.totalorder %s2154_s12, 1 }
   0x9   : > { %p2211_p4 = por %p2519_p1, %p39_p0  ;;  %p97_p7 = scmp.lt.s32.totalorder %s2154_s12, 3 }
   0xa   : > { %p2216_p6 = por %p90_p3, %p39_p0  ;;  %s2156_s18 = smov [#allocation5]  }
   0xb   : > { %s2522_s15 = scalar_select %p2211_p4, 1, 0 }
   0xc   : > { %s2523_s16 = scalar_select %p2216_p6, 1, 0 }
   0xd   : > { %p2221_p8 = pnand %p1400_p5, %p97_p7  ;;  %s109_s19 = sshll.u32 %s2156_s18, 4  ;;  %s2225_s19 = int_to_ptr.vmem [resolvable:$true] %s109_s19 }
   0xe   : > { %s2237_s21 = sadd.s32 1, %s2154_s12   ;;  %s26_s22 = sadd.s32 1, %s2150_s11 }
   0xf   : > { %s2524_s17 = scalar_select %p2221_p8, 1, 0 }
  0x10   : > { %p1858_p9 = pneg %p2221_p8  ;;  %s23_s23 = ssub.s32 %s2154_s12, %s2237_s21 }
  0x11   : > { %s2026_s26 = scalar_lea.hbm %s2517_s1, 2048 }
  0x12   : > { %p2232_p11 = pnand %p1858_p9, %p2519_p1  ;;  %p2027_p12 = scmp.ne.s32.totalorder %s2517_s1, %s2026_s26 }
  0x13   : > { %p2033_p5 = scmp.lt.u32.totalorder %s2026_s26, %s2517_s1 }
  0x14   : > { %p2028_p13 = pneg %p2232_p11 }
  0x16   : > { %p2029_p0 = pnand %p2028_p13, %p2027_p12 }
  0x18   : > { %p2030_p3 = pneg %p2029_p0 }
  0x1a   : > { %p2035_p7 = pnand %p2033_p5, %p2030_p3 }
  0x1c   : > { %2038 = shalt.err (!%p2035_p7)
}
  0x1d   : > { %s2039_s3 = scalar_lea.vmem %s2225_s19, 2048  ;;  %p2047_p2 = scmp.lt.s32.totalorder %s2225_s19, %s2225_s19 }
  0x1e   : > { %p2040_p9 = scmp.ne.s32.totalorder %s2225_s19, %s2039_s3  ;;  %p2048_p6 = scmp.lt.s32.totalorder %s2039_s3, %s2039_s3 }
  0x20   : > { %p2042_p10 = pnand %p2040_p9, %p2028_p13  ;;  %p2049_p4 = por %p2048_p6, %p2047_p2 }
  0x22   : > { %p2043_p1 = pneg %p2042_p10 }
  0x24   : > { %p2050_p8 = pnand %p2049_p4, %p2043_p1 }
  0x26   : > { %2053 = shalt.err (!%p2050_p8)
}
  0x27   : > { %s2157_s4 = smov 64   ;;  %s2158_s5 = smov 4  }
  0x28   : > { %1861 = dma.hbm_to_vmem [thread:$0]  (!%p2232_p11), %s2517_s1, 2048, %s2225_s19, [#allocation6], %s2157_s4, %s2157_s4, %s2158_s5  }
  0x29   : > { %p24_p2 = scmp.eq.s32.totalorder %s23_s23, 0  ;;  %p33_p1 = scmp.ne.s32.totalorder %s2150_s11, %s2146_s10 }
  0x2a   : > { %p34_p4 = scmp.eq.s32.totalorder %s2154_s12, 0  ;;  %p1871_p6 = scmp.lt.s32.totalorder %s2154_s12, 2 }
  0x2b   : > { %s2268_s8 = scalar_select %p24_p2, %s2150_s11, %s26_s22  }
  0x2c   : > { %p35_p8 = por %p34_p4, %p33_p1  ;;  %p2526_p10 = scmp.eq.s32.totalorder %s2202_s13, 1 }
  0x2d   : > { %s123_s18 = sand.u32 1, %s2150_s11   ;;  %s1561_s24 = sshll.u32 %s2154_s12, 13 }
  0x2e   : > { %p2272_p12 = por %p2526_p10, %p33_p1  ;;  %s1403_s25 = sshll.u32 %s123_s18, 9 }
  0x2f   : > { %s2281_s27 = scalar_lea.hbm %s2516_s0, %s1561_s24  ;;  %s127_s19 = scalar_lea.vmem [#allocation2], %s1403_s25 }
  0x30   : > { %s135_s22 = sshll.u32 %s127_s19, 4  ;;  %p2283_p11 = pnand %p1871_p6, %p35_p8  ;;  %s2287_s22 = int_to_ptr.vmem [resolvable:$true] %s135_s22 }
  0x31   : > { %s2289_s28 = scalar_lea.sflag [#allocation3], %s123_s18  ;;  %s2054_s29 = scalar_lea.hbm %s2281_s27, 8192 }
  0x32   : > { %p2055_p13 = scmp.ne.s32.totalorder %s2281_s27, %s2054_s29  ;;  %p2056_p0 = pneg %p2283_p11 }
  0x33   : > { %s2059_s4 = scalar_lea.hbm %s2516_s0, 16384  ;;  %p2060_p7 = scmp.lt.u32.totalorder %s2281_s27, %s2516_s0 }
  0x34   : > { %p2057_p3 = pnand %p2056_p0, %p2055_p13  ;;  %p2061_p9 = scmp.lt.u32.totalorder %s2059_s4, %s2054_s29 }
  0x35   : > { %p2063_p1 = scmp.lt.u32.totalorder %s2054_s29, %s2281_s27 }
  0x36   : > { %p2058_p5 = pneg %p2057_p3  ;;  %p2062_p2 = por %p2061_p9, %p2060_p7 }
  0x38   : > { %p2064_p4 = por %p2063_p1, %p2062_p2 }
  0x3a   : > { %p2065_p6 = pnand %p2064_p4, %p2058_p5 }
  0x3c   : > { %2068 = shalt.err (!%p2065_p6)
}
  0x3d   : > { %s2069_s7 = scalar_lea.vmem %s2287_s22, 8192  ;;  %s2159_s18 = smov [#allocation2]  }
  0x3e   : > { %p2070_p8 = scmp.ne.s32.totalorder %s2287_s22, %s2069_s7  ;;  %s2074_s24 = sshll.u32 %s2159_s18, 4  ;;  %s2075_s24 = int_to_ptr.vmem [resolvable:$false] %s2074_s24 }
  0x3f   : > { %s2076_s25 = scalar_lea.vmem %s2075_s24, 16384  ;;  %p2077_p3 = scmp.lt.s32.totalorder %s2287_s22, %s2075_s24 }
  0x40   : > { %p2072_p10 = pnand %p2070_p8, %p2056_p0  ;;  %p2078_p7 = scmp.lt.s32.totalorder %s2076_s25, %s2069_s7 }
  0x42   : > { %p2073_p13 = pneg %p2072_p10  ;;  %p2079_p9 = por %p2078_p7, %p2077_p3 }
  0x44   : > { %p2080_p2 = pnand %p2079_p9, %p2073_p13 }
  0x46   : > { %2083 = shalt.err (!%p2080_p2)
}
  0x47   : > { %s2160_s20 = smov 128   ;;  %s2161_s26 = smov 8  }
  0x48   : > { %1865 = dma.hbm_to_vmem [thread:$0]  (!%p2283_p11), %s2281_s27, 8192, %s2287_s22, %s2289_s28, %s2160_s20, %s2160_s20, %s2161_s26  }
  0x49   : > { %p2529_p0 = scmp.ne.s32.totalorder %s2524_s17, 0 }
  0x4a   : > { %s2320_s19 = sand.u32 (!%p2529_p0), 1, %s2146_s10   ;;  %p2530_p5 = scmp.ne.s32.totalorder (!%p2529_p0), %s2522_s15, 0 }
  0x4b   : > { %147 = sbr.rel (%p2529_p0) target bundleno = 502 (0x1f6), region = 28  ;;  %s1408_s29 = sshll.u32 (!%p2529_p0), %s2320_s19, 9 }
  0x4c   : > { %s150_s30 = scalar_lea.sflag (!%p2529_p0), [#allocation3], %s2320_s19  ;;  %s2324_s3 = scalar_lea.vmem (!%p2529_p0), [#allocation2], %s1408_s29 }
  0x52   : > { %2129 = dma.done.wait (%p2530_p5), %s150_s30, 8192  }
  0x53   : > { %2131 = vsyncadd (%p2530_p5), %s150_s30, 4294959104  ;;  %p2531_p11 = scmp.eq.s32.totalorder %s2202_s13, 0 }
  0x55   : > { %2133 = dma.done.wait (%p2531_p11), [#allocation6], 2048   ;;  %p2532_p1 = pmov %p2531_p11 }
  0x56   : > { %v2162_v0 = vmov 0   ;;  %v1914_v1 = vld [vmem:[#allocation5] sm:$0xff]   ;;  %v1915_v2 = vld [vmem:[#allocation5 + $0x8] sm:$0xff]   ;;  %v1916_v3 = vld [vmem:[#allocation5 + $0x10] sm:$0xff]   ;;  %s1410_s15 = sshll.u32 %s2320_s19, 8  ;;  %s1626_s27 = sshll.u32 %s2202_s13, 12 }
  0x57   : > { %2135 = vsyncadd (%p2532_p1), [#allocation6], 4294965248  ;;  %693 = vmatprep.subr.bf16.mxu0 %v2162_v0  ;;  %1818 = vmatprep.subr.bf16.mxu1 %v2162_v0  ;;  %v1917_v4 = vld [vmem:[#allocation5 + $0x18] sm:$0xff]   ;;  %v1918_v5 = vld [vmem:[#allocation5 + $0x20] sm:$0xff]   ;;  %s2431_s17 = scalar_lea.vmem [#allocation7], %s1410_s15  ;;  %s2468_s4 = scalar_lea.hbm %s2518_s2, %s1626_s27 }
  0x58   : > { %694 = vmatpush1.bf16.msra.mxu0 %v1914_v1  ;;  %1834 = vmatpush1.bf16.msra.mxu1 %v1914_v1  ;;  %v1932_v6 = vld [vmem:[%s2324_s3 + $0x4] ss:$8 sps:$4 sm:$0xff]   ;;  %v1920_v9 = vld [vmem:[#allocation5 + $0x30] sm:$0xff]   ;;  %v1921_v10 = vld [vmem:[#allocation5 + $0x38] sm:$0xff]   ;;  %s1316_s22 = sshll.u32 %s2431_s17, 4  ;;  %s1303_s13 = scalar_lea.sflag [#allocation4], %s2320_s19  ;;  %s2470_s22 = int_to_ptr.vmem [resolvable:$true] %s1316_s22 }
  0x59   : > { %695 = vmatprep.subr.bf16.mxu0 %v2162_v0  ;;  %1819 = vmatprep.subr.bf16.mxu1 %v2162_v0  ;;  %v1919_v7 = vld [vmem:[#allocation5 + $0x28] sm:$0xff]   ;;  %v1922_v11 = vld [vmem:[#allocation5 + $0x40] sm:$0xff]   ;;  %v1924_v13 = vld [vmem:[#allocation5 + $0x50] sm:$0xff]   ;;  %s2084_s5 = scalar_lea.vmem %s2470_s22, 4096  ;;  %s2163_s6 = smov [#allocation7]  }
  0x5a   : > { %v1935_v8 = vld [vmem:[%s2324_s3 + $0x104] ss:$8 sps:$4 sm:$0xff]   ;;  %725 = vmatprep.mubr.bf16.mxu0 %v1932_v6  ;;  %v1925_v14 = vld [vmem:[#allocation5 + $0x58] sm:$0xff]   ;;  %v1928_v17 = vld [vmem:[#allocation5 + $0x70] sm:$0xff]   ;;  %p2085_p4 = scmp.ne.s32.totalorder %s2470_s22, %s2084_s5  ;;  %s2088_s7 = sshll.u32 %s2163_s6, 4  ;;  %s2089_s7 = int_to_ptr.vmem [resolvable:$false] %s2088_s7 }
  0x5b   : > { %853 = vmatprep.mubr.bf16.mxu1 %v1935_v8  ;;  %v1923_v12 = vld [vmem:[#allocation5 + $0x48] sm:$0xff]   ;;  %v1926_v15 = vld [vmem:[#allocation5 + $0x60] sm:$0xff]   ;;  %v1929_v18 = vld [vmem:[#allocation5 + $0x78] sm:$0xff]   ;;  %s2090_s18 = scalar_lea.vmem %s2089_s7, 8192  ;;  %p2091_p10 = scmp.lt.s32.totalorder %s2470_s22, %s2089_s7 }
  0x5c   : > { %696 = vmatpush1.bf16.msra.mxu0 %v1915_v2  ;;  %1835 = vmatpush1.bf16.msra.mxu1 %v1915_v2  ;;  %v1927_v16 = vld [vmem:[#allocation5 + $0x68] sm:$0xff]   ;;  %v1936_v21 = vld [vmem:[%s2324_s3 + $0x14] ss:$8 sps:$4 sm:$0xff]   ;;  %v1940_v23 = vld [vmem:[%s2324_s3 + $0x10] ss:$8 sps:$4 sm:$0xff]   ;;  %p2086_p6 = pnand %p2085_p4, %p2272_p12  ;;  %p2092_p13 = scmp.lt.s32.totalorder %s2090_s18, %s2084_s5 }
  0x5d   : > { %697 = vmatprep.subr.bf16.mxu0 %v2162_v0  ;;  %1820 = vmatprep.subr.bf16.mxu1 %v2162_v0  ;;  %v1930_v19 = vld [vmem:[%s2324_s3] ss:$8 sps:$4 sm:$0xff]   ;;  %v1938_v22 = vld [vmem:[%s2324_s3 + $0x114] ss:$8 sps:$4 sm:$0xff]   ;;  %v1941_v24 = vld [vmem:[%s2324_s3 + $0x110] ss:$8 sps:$4 sm:$0xff]  }
  0x5e   : > { %v1933_v20 = vld [vmem:[%s2324_s3 + $0x100] ss:$8 sps:$4 sm:$0xff]   ;;  %v1942_v25 = vld [vmem:[%s2324_s3 + $0x24] ss:$8 sps:$4 sm:$0xff]   ;;  %v1948_v29 = vld [vmem:[%s2324_s3 + $0x34] ss:$8 sps:$4 sm:$0xff]   ;;  %p2087_p8 = pneg %p2086_p6  ;;  %p2093_p3 = por %p2092_p13, %p2091_p10 }
  0x5f   : > { %v1944_v26 = vld [vmem:[%s2324_s3 + $0x124] ss:$8 sps:$4 sm:$0xff]   ;;  %v1946_v27 = vld [vmem:[%s2324_s3 + $0x20] ss:$8 sps:$4 sm:$0xff]   ;;  %v1950_v30 = vld [vmem:[%s2324_s3 + $0x134] ss:$8 sps:$4 sm:$0xff]  }
  0x60   : > { %698 = vmatpush1.bf16.msra.mxu0 %v1916_v3  ;;  %1836 = vmatpush1.bf16.msra.mxu1 %v1916_v3  ;;  %v1947_v28 = vld [vmem:[%s2324_s3 + $0x120] ss:$8 sps:$4 sm:$0xff]   ;;  %v1952_v31 = vld [vmem:[%s2324_s3 + $0x30] ss:$8 sps:$4 sm:$0xff]   ;;  %v1954_v33 = vld [vmem:[%s2324_s3 + $0x44] ss:$8 sps:$4 sm:$0xff]   ;;  %p2094_p7 = pnand %p2093_p3, %p2087_p8 }
  0x61   : > { %699 = vmatprep.subr.bf16.mxu0 %v2162_v0  ;;  %1821 = vmatprep.subr.bf16.mxu1 %v2162_v0  ;;  %v1953_v32 = vld [vmem:[%s2324_s3 + $0x130] ss:$8 sps:$4 sm:$0xff]   ;;  %v1956_v34 = vld [vmem:[%s2324_s3 + $0x144] ss:$8 sps:$4 sm:$0xff]   ;;  %v1958_v35 = vld [vmem:[%s2324_s3 + $0x40] ss:$8 sps:$4 sm:$0xff]  }
  0x62   : > { %v1959_v36 = vld [vmem:[%s2324_s3 + $0x140] ss:$8 sps:$4 sm:$0xff]   ;;  %v1960_v37 = vld [vmem:[%s2324_s3 + $0x54] ss:$8 sps:$4 sm:$0xff]   ;;  %v1964_v39 = vld [vmem:[%s2324_s3 + $0x50] ss:$8 sps:$4 sm:$0xff]  }
  0x63   : > { %v1962_v38 = vld [vmem:[%s2324_s3 + $0x154] ss:$8 sps:$4 sm:$0xff]   ;;  %v1965_v40 = vld [vmem:[%s2324_s3 + $0x150] ss:$8 sps:$4 sm:$0xff]   ;;  %v1966_v41 = vld [vmem:[%s2324_s3 + $0x64] ss:$8 sps:$4 sm:$0xff]  }
  0x64   : > { %700 = vmatpush1.bf16.msra.mxu0 %v1917_v4  ;;  %1837 = vmatpush1.bf16.msra.mxu1 %v1917_v4  ;;  %v1968_v42 = vld [vmem:[%s2324_s3 + $0x164] ss:$8 sps:$4 sm:$0xff]   ;;  %v1970_v43 = vld [vmem:[%s2324_s3 + $0x60] ss:$8 sps:$4 sm:$0xff]   ;;  %v1972_v45 = vld [vmem:[%s2324_s3 + $0x74] ss:$8 sps:$4 sm:$0xff]  }
  0x65   : > { %701 = vmatprep.subr.bf16.mxu0 %v2162_v0  ;;  %1822 = vmatprep.subr.bf16.mxu1 %v2162_v0  ;;  %v1971_v44 = vld [vmem:[%s2324_s3 + $0x160] ss:$8 sps:$4 sm:$0xff]   ;;  %v1974_v46 = vld [vmem:[%s2324_s3 + $0x174] ss:$8 sps:$4 sm:$0xff]   ;;  %v1976_v47 = vld [vmem:[%s2324_s3 + $0x70] ss:$8 sps:$4 sm:$0xff]  }
  0x66   : > { %v1977_v48 = vld [vmem:[%s2324_s3 + $0x170] ss:$8 sps:$4 sm:$0xff]   ;;  %v1978_v49 = vld [vmem:[%s2324_s3 + $0x84] ss:$8 sps:$4 sm:$0xff]   ;;  %v1982_v51 = vld [vmem:[%s2324_s3 + $0x80] ss:$8 sps:$4 sm:$0xff]  }
  0x67   : > { %v1980_v50 = vld [vmem:[%s2324_s3 + $0x184] ss:$8 sps:$4 sm:$0xff]   ;;  %v1983_v52 = vld [vmem:[%s2324_s3 + $0x180] ss:$8 sps:$4 sm:$0xff]   ;;  %v1984_v53 = vld [vmem:[%s2324_s3 + $0x94] ss:$8 sps:$4 sm:$0xff]  }
  0x68   : > { %702 = vmatpush1.bf16.msra.mxu0 %v1918_v5  ;;  %1838 = vmatpush1.bf16.msra.mxu1 %v1918_v5  ;;  %v1986_v54 = vld [vmem:[%s2324_s3 + $0x194] ss:$8 sps:$4 sm:$0xff]   ;;  %v1988_v55 = vld [vmem:[%s2324_s3 + $0x90] ss:$8 sps:$4 sm:$0xff]   ;;  %v1990_v57 = vld [vmem:[%s2324_s3 + $0xa4] ss:$8 sps:$4 sm:$0xff]  }
  0x69   : > { %703 = vmatprep.subr.bf16.mxu0 %v2162_v0  ;;  %1823 = vmatprep.subr.bf16.mxu1 %v2162_v0  ;;  %v1989_v56 = vld [vmem:[%s2324_s3 + $0x190] ss:$8 sps:$4 sm:$0xff]   ;;  %v1992_v58 = vld [vmem:[%s2324_s3 + $0x1a4] ss:$8 sps:$4 sm:$0xff]   ;;  %v1994_v59 = vld [vmem:[%s2324_s3 + $0xa0] ss:$8 sps:$4 sm:$0xff]  }
  0x6a   : > { %v1995_v60 = vld [vmem:[%s2324_s3 + $0x1a0] ss:$8 sps:$4 sm:$0xff]   ;;  %v1996_v61 = vld [vmem:[%s2324_s3 + $0xb4] ss:$8 sps:$4 sm:$0xff]   ;;  %v2000_v63 = vld [vmem:[%s2324_s3 + $0xb0] ss:$8 sps:$4 sm:$0xff]  }
  0x6b   : > { %v1998_v62 = vld [vmem:[%s2324_s3 + $0x1b4] ss:$8 sps:$4 sm:$0xff]   ;;  %v2002_v1 = vld [vmem:[%s2324_s3 + $0xc4] ss:$8 sps:$4 sm:$0xff]   ;;  %v2006_v3 = vld [vmem:[%s2324_s3 + $0xc0] ss:$8 sps:$4 sm:$0xff]  }
  0x6c   : > { %704 = vmatpush1.bf16.msra.mxu0 %v1919_v7  ;;  %1839 = vmatpush1.bf16.msra.mxu1 %v1919_v7  ;;  %v2004_v2 = vld [vmem:[%s2324_s3 + $0x1c4] ss:$8 sps:$4 sm:$0xff]   ;;  %v2007_v4 = vld [vmem:[%s2324_s3 + $0x1c0] ss:$8 sps:$4 sm:$0xff]   ;;  %v2008_v5 = vld [vmem:[%s2324_s3 + $0xd4] ss:$8 sps:$4 sm:$0xff]  }
  0x6d   : > { %705 = vmatprep.subr.bf16.mxu0 %v2162_v0  ;;  %1824 = vmatprep.subr.bf16.mxu1 %v2162_v0  ;;  %v2010_v6 = vld [vmem:[%s2324_s3 + $0x1d4] ss:$8 sps:$4 sm:$0xff]   ;;  %v2012_v7 = vld [vmem:[%s2324_s3 + $0xd0] ss:$8 sps:$4 sm:$0xff]  }
  0x6e   : > { %v2013_v8 = vld [vmem:[%s2324_s3 + $0x1d0] ss:$8 sps:$4 sm:$0xff]  }
  0x70   : > { %706 = vmatpush1.bf16.msra.mxu0 %v1920_v9  ;;  %1840 = vmatpush1.bf16.msra.mxu1 %v1920_v9  ;;  %v2014_v9 = vld [vmem:[%s2324_s3 + $0xe4] ss:$8 sps:$4 sm:$0xff]  }
  0x71   : > { %707 = vmatprep.subr.bf16.mxu0 %v2162_v0  ;;  %1825 = vmatprep.subr.bf16.mxu1 %v2162_v0 }
  0x74   : > { %708 = vmatpush1.bf16.msra.mxu0 %v1921_v10  ;;  %1841 = vmatpush1.bf16.msra.mxu1 %v1921_v10  ;;  %v2016_v10 = vld [vmem:[%s2324_s3 + $0x1e4] ss:$8 sps:$4 sm:$0xff]  }
  0x75   : > { %709 = vmatprep.subr.bf16.mxu0 %v2162_v0  ;;  %1826 = vmatprep.subr.bf16.mxu1 %v2162_v0 }
  0x78   : > { %710 = vmatpush1.bf16.msra.mxu0 %v1922_v11  ;;  %1842 = vmatpush1.bf16.msra.mxu1 %v1922_v11  ;;  %v2018_v11 = vld [vmem:[%s2324_s3 + $0xe0] ss:$8 sps:$4 sm:$0xff]  }
  0x79   : > { %711 = vmatprep.subr.bf16.mxu0 %v2162_v0  ;;  %1827 = vmatprep.subr.bf16.mxu1 %v2162_v0 }
  0x7c   : > { %712 = vmatpush1.bf16.msra.mxu0 %v1923_v12  ;;  %1843 = vmatpush1.bf16.msra.mxu1 %v1923_v12  ;;  %v2019_v12 = vld [vmem:[%s2324_s3 + $0x1e0] ss:$8 sps:$4 sm:$0xff]  }
  0x7d   : > { %713 = vmatprep.subr.bf16.mxu0 %v2162_v0  ;;  %1828 = vmatprep.subr.bf16.mxu1 %v2162_v0 }
  0x80   : > { %714 = vmatpush1.bf16.msra.mxu0 %v1924_v13  ;;  %1844 = vmatpush1.bf16.msra.mxu1 %v1924_v13  ;;  %v2020_v13 = vld [vmem:[%s2324_s3 + $0xf4] ss:$8 sps:$4 sm:$0xff]  }
  0x81   : > { %715 = vmatprep.subr.bf16.mxu0 %v2162_v0  ;;  %1829 = vmatprep.subr.bf16.mxu1 %v2162_v0 }
  0x84   : > { %716 = vmatpush1.bf16.msra.mxu0 %v1925_v14  ;;  %1845 = vmatpush1.bf16.msra.mxu1 %v1925_v14  ;;  %v2022_v14 = vld [vmem:[%s2324_s3 + $0x1f4] ss:$8 sps:$4 sm:$0xff]  }
  0x85   : > { %717 = vmatprep.subr.bf16.mxu0 %v2162_v0  ;;  %1830 = vmatprep.subr.bf16.mxu1 %v2162_v0 }
  0x88   : > { %718 = vmatpush1.bf16.msra.mxu0 %v1926_v15  ;;  %1846 = vmatpush1.bf16.msra.mxu1 %v1926_v15  ;;  %v2024_v15 = vld [vmem:[%s2324_s3 + $0xf0] ss:$8 sps:$4 sm:$0xff]  }
  0x89   : > { %719 = vmatprep.subr.bf16.mxu0 %v2162_v0  ;;  %1831 = vmatprep.subr.bf16.mxu1 %v2162_v0 }
  0x8c   : > { %720 = vmatpush1.bf16.msra.mxu0 %v1927_v16  ;;  %1847 = vmatpush1.bf16.msra.mxu1 %v1927_v16  ;;  %v2025_v16 = vld [vmem:[%s2324_s3 + $0x1f0] ss:$8 sps:$4 sm:$0xff]  }
  0x8d   : > { %721 = vmatprep.subr.bf16.mxu0 %v2162_v0  ;;  %1832 = vmatprep.subr.bf16.mxu1 %v2162_v0 }
  0x90   : > { %722 = vmatpush1.bf16.msra.mxu0 %v1928_v17  ;;  %1848 = vmatpush1.bf16.msra.mxu1 %v1928_v17 }
  0x91   : > { %723 = vmatprep.subr.bf16.mxu0 %v2162_v0  ;;  %1833 = vmatprep.subr.bf16.mxu1 %v2162_v0  ;;  %v2001_v0 = vld [vmem:[%s2324_s3 + $0x1b0] ss:$8 sps:$4 sm:$0xff]  }
  0x94   : > { %724 = vmatpush1.bf16.msra.mxu0 %v1929_v18  ;;  %1849 = vmatpush1.bf16.msra.mxu1 %v1929_v18 }
  0x97   : > { %726 = vmatmul.mubr.bf16.vlgmr.msra.gmra.mrb[0].mxu0 %v1930_v19  ;;  %854 = vmatmul.mubr.bf16.vlgmr.msra.gmra.mrb[0].mxu1 %v1933_v20 }
  0x98   : > { %733 = vmatprep.mubr.bf16.mxu0 %v1936_v21  ;;  %861 = vmatprep.mubr.bf16.mxu1 %v1938_v22 }
  0x9f   : > { %734 = vmatmul.mubr.bf16.gmra.mrb[4].mxu0 %v1940_v23  ;;  %862 = vmatmul.mubr.bf16.gmra.mrb[4].mxu1 %v1941_v24 }
  0xa0   : > { %741 = vmatprep.mubr.bf16.mxu0 %v1942_v25  ;;  %869 = vmatprep.mubr.bf16.mxu1 %v1944_v26 }
  0xa7   : > { %742 = vmatmul.mubr.bf16.gmra.mrb[8].mxu0 %v1946_v27  ;;  %870 = vmatmul.mubr.bf16.gmra.mrb[8].mxu1 %v1947_v28 }
  0xa8   : > { %749 = vmatprep.mubr.bf16.mxu0 %v1948_v29  ;;  %877 = vmatprep.mubr.bf16.mxu1 %v1950_v30 }
  0xaf   : > { %750 = vmatmul.mubr.bf16.gmra.mrb[12].mxu0 %v1952_v31  ;;  %878 = vmatmul.mubr.bf16.gmra.mrb[12].mxu1 %v1953_v32 }
  0xb0   : > { %757 = vmatprep.mubr.bf16.mxu0 %v1954_v33  ;;  %885 = vmatprep.mubr.bf16.mxu1 %v1956_v34 }
  0xb7   : > { %758 = vmatmul.mubr.bf16.gmra.mrb[16].mxu0 %v1958_v35  ;;  %886 = vmatmul.mubr.bf16.gmra.mrb[16].mxu1 %v1959_v36 }
  0xb8   : > { %765 = vmatprep.mubr.bf16.mxu0 %v1960_v37  ;;  %893 = vmatprep.mubr.bf16.mxu1 %v1962_v38 }
  0xbf   : > { %766 = vmatmul.mubr.bf16.gmra.mrb[20].mxu0 %v1964_v39  ;;  %894 = vmatmul.mubr.bf16.gmra.mrb[20].mxu1 %v1965_v40 }
  0xc0   : > { %773 = vmatprep.mubr.bf16.mxu0 %v1966_v41  ;;  %901 = vmatprep.mubr.bf16.mxu1 %v1968_v42 }
  0xc7   : > { %774 = vmatmul.mubr.bf16.gmra.mrb[24].mxu0 %v1970_v43  ;;  %902 = vmatmul.mubr.bf16.gmra.mrb[24].mxu1 %v1971_v44 }
  0xc8   : > { %781 = vmatprep.mubr.bf16.mxu0 %v1972_v45  ;;  %909 = vmatprep.mubr.bf16.mxu1 %v1974_v46 }
  0xcf   : > { %782 = vmatmul.mubr.bf16.gmra.mrb[28].mxu0 %v1976_v47  ;;  %910 = vmatmul.mubr.bf16.gmra.mrb[28].mxu1 %v1977_v48 }
  0xd0   : > { %789 = vmatprep.mubr.bf16.mxu0 %v1978_v49  ;;  %917 = vmatprep.mubr.bf16.mxu1 %v1980_v50 }
  0xd7   : > { %790 = vmatmul.mubr.bf16.gmra.mrb[32].mxu0 %v1982_v51  ;;  %918 = vmatmul.mubr.bf16.gmra.mrb[32].mxu1 %v1983_v52 }
  0xd8   : > { %797 = vmatprep.mubr.bf16.mxu0 %v1984_v53  ;;  %925 = vmatprep.mubr.bf16.mxu1 %v1986_v54 }
  0xdf   : > { %798 = vmatmul.mubr.bf16.gmra.mrb[36].mxu0 %v1988_v55  ;;  %926 = vmatmul.mubr.bf16.gmra.mrb[36].mxu1 %v1989_v56 }
  0xe0   : > { %805 = vmatprep.mubr.bf16.mxu0 %v1990_v57  ;;  %933 = vmatprep.mubr.bf16.mxu1 %v1992_v58 }
  0xe7   : > { %806 = vmatmul.mubr.bf16.gmra.mrb[40].mxu0 %v1994_v59  ;;  %934 = vmatmul.mubr.bf16.gmra.mrb[40].mxu1 %v1995_v60 }
  0xe8   : > { %813 = vmatprep.mubr.bf16.mxu0 %v1996_v61  ;;  %941 = vmatprep.mubr.bf16.mxu1 %v1998_v62 }
  0xef   : > { %814 = vmatmul.mubr.bf16.gmra.mrb[44].mxu0 %v2000_v63  ;;  %942 = vmatmul.mubr.bf16.gmra.mrb[44].mxu1 %v2001_v0 }
  0xf0   : > { %821 = vmatprep.mubr.bf16.mxu0 %v2002_v1  ;;  %949 = vmatprep.mubr.bf16.mxu1 %v2004_v2 }
  0xf7   : > { %822 = vmatmul.mubr.bf16.gmra.mrb[48].mxu0 %v2006_v3  ;;  %950 = vmatmul.mubr.bf16.gmra.mrb[48].mxu1 %v2007_v4 }
  0xf8   : > { %829 = vmatprep.mubr.bf16.mxu0 %v2008_v5  ;;  %957 = vmatprep.mubr.bf16.mxu1 %v2010_v6 }
  0xff   : > { %830 = vmatmul.mubr.bf16.gmra.mrb[52].mxu0 %v2012_v7  ;;  %958 = vmatmul.mubr.bf16.gmra.mrb[52].mxu1 %v2013_v8 }
 0x100   : > { %837 = vmatprep.mubr.bf16.mxu0 %v2014_v9  ;;  %965 = vmatprep.mubr.bf16.mxu1 %v2016_v10 }
 0x107   : > { %838 = vmatmul.mubr.bf16.gmra.mrb[56].mxu0 %v2018_v11  ;;  %966 = vmatmul.mubr.bf16.gmra.mrb[56].mxu1 %v2019_v12 }
 0x108   : > { %845 = vmatprep.mubr.bf16.mxu0 %v2020_v13  ;;  %973 = vmatprep.mubr.bf16.mxu1 %v2022_v14 }
 0x10f   : > { %846 = vmatmul.mubr.bf16.gmra.mrb[60].mxu0 %v2024_v15  ;;  %974 = vmatmul.mubr.bf16.gmra.mrb[60].mxu1 %v2025_v16 }
 0x16a   : > { %v727_v17 = vpop.f32.mrb[0].mxu0  ;;  %v855_v18 = vpop.f32.mrb[0].mxu1 }
 0x16b   : > { %v729_v19 = vpop.f32.mrb[1].mxu0  ;;  %v857_v20 = vpop.f32.mrb[1].mxu1 }
 0x16c   : > { %v730_v21 = vpop.f32.mrb[2].mxu0  ;;  %v858_v22 = vpop.f32.mrb[2].mxu1 }
 0x16d   : > { %v1630_v23 = vpack.c.bf16 %v730_v21, %v727_v17  ;;  %v1710_v24 = vpack.c.bf16 %v858_v22, %v855_v18  ;;  %v732_v25 = vpop.f32.mrb[3].mxu0  ;;  %v860_v26 = vpop.f32.mrb[3].mxu1 }
 0x16f   : > { %1631 = vst [vmem:[%s2431_s17] sm:$0xff] %v1630_v23   ;;  %1802 = vst [vmem:[%s2431_s17 + $0x80] sm:$0xff] %v1710_v24  }
 0x172   : > { %v735_v27 = vpop.f32.mrb[4].mxu0  ;;  %v863_v28 = vpop.f32.mrb[4].mxu1 }
 0x173   : > { %v737_v29 = vpop.f32.mrb[5].mxu0  ;;  %v865_v30 = vpop.f32.mrb[5].mxu1 }
 0x174   : > { %v738_v31 = vpop.f32.mrb[6].mxu0  ;;  %v866_v32 = vpop.f32.mrb[6].mxu1 }
 0x175   : > { %v1635_v33 = vpack.c.bf16 %v738_v31, %v735_v27  ;;  %v1715_v34 = vpack.c.bf16 %v866_v32, %v863_v28  ;;  %v740_v35 = vpop.f32.mrb[7].mxu0  ;;  %v868_v36 = vpop.f32.mrb[7].mxu1 }
 0x177   : > { %1787 = vst [vmem:[%s2431_s17 + $0x8] sm:$0xff] %v1635_v33   ;;  %1803 = vst [vmem:[%s2431_s17 + $0x88] sm:$0xff] %v1715_v34  }
 0x17a   : > { %v743_v37 = vpop.f32.mrb[8].mxu0  ;;  %v871_v38 = vpop.f32.mrb[8].mxu1 }
 0x17b   : > { %v745_v39 = vpop.f32.mrb[9].mxu0  ;;  %v873_v40 = vpop.f32.mrb[9].mxu1 }
 0x17c   : > { %v746_v41 = vpop.f32.mrb[10].mxu0  ;;  %v874_v42 = vpop.f32.mrb[10].mxu1 }
 0x17d   : > { %v1640_v43 = vpack.c.bf16 %v746_v41, %v743_v37  ;;  %v1720_v44 = vpack.c.bf16 %v874_v42, %v871_v38  ;;  %v748_v45 = vpop.f32.mrb[11].mxu0  ;;  %v876_v46 = vpop.f32.mrb[11].mxu1 }
 0x17f   : > { %1788 = vst [vmem:[%s2431_s17 + $0x10] sm:$0xff] %v1640_v43   ;;  %1804 = vst [vmem:[%s2431_s17 + $0x90] sm:$0xff] %v1720_v44  }
 0x182   : > { %v751_v47 = vpop.f32.mrb[12].mxu0  ;;  %v879_v48 = vpop.f32.mrb[12].mxu1 }
 0x183   : > { %v753_v49 = vpop.f32.mrb[13].mxu0  ;;  %v881_v50 = vpop.f32.mrb[13].mxu1 }
 0x184   : > { %v754_v51 = vpop.f32.mrb[14].mxu0  ;;  %v882_v52 = vpop.f32.mrb[14].mxu1 }
 0x185   : > { %v1645_v53 = vpack.c.bf16 %v754_v51, %v751_v47  ;;  %v1725_v54 = vpack.c.bf16 %v882_v52, %v879_v48  ;;  %v756_v55 = vpop.f32.mrb[15].mxu0  ;;  %v884_v56 = vpop.f32.mrb[15].mxu1 }
 0x187   : > { %1789 = vst [vmem:[%s2431_s17 + $0x18] sm:$0xff] %v1645_v53   ;;  %1805 = vst [vmem:[%s2431_s17 + $0x98] sm:$0xff] %v1725_v54  }
 0x18a   : > { %v759_v57 = vpop.f32.mrb[16].mxu0  ;;  %v887_v58 = vpop.f32.mrb[16].mxu1 }
 0x18b   : > { %v761_v59 = vpop.f32.mrb[17].mxu0  ;;  %v889_v60 = vpop.f32.mrb[17].mxu1 }
 0x18c   : > { %v762_v61 = vpop.f32.mrb[18].mxu0  ;;  %v890_v62 = vpop.f32.mrb[18].mxu1 }
 0x18d   : > { %v1650_v63 = vpack.c.bf16 %v762_v61, %v759_v57  ;;  %v1730_v0 = vpack.c.bf16 %v890_v62, %v887_v58  ;;  %v764_v1 = vpop.f32.mrb[19].mxu0  ;;  %v892_v2 = vpop.f32.mrb[19].mxu1 }
 0x18f   : > { %1790 = vst [vmem:[%s2431_s17 + $0x20] sm:$0xff] %v1650_v63   ;;  %1806 = vst [vmem:[%s2431_s17 + $0xa0] sm:$0xff] %v1730_v0  }
 0x192   : > { %v767_v3 = vpop.f32.mrb[20].mxu0  ;;  %v895_v4 = vpop.f32.mrb[20].mxu1 }
 0x193   : > { %v769_v5 = vpop.f32.mrb[21].mxu0  ;;  %v897_v6 = vpop.f32.mrb[21].mxu1 }
 0x194   : > { %v770_v7 = vpop.f32.mrb[22].mxu0  ;;  %v898_v8 = vpop.f32.mrb[22].mxu1 }
 0x195   : > { %v1655_v9 = vpack.c.bf16 %v770_v7, %v767_v3  ;;  %v1735_v10 = vpack.c.bf16 %v898_v8, %v895_v4  ;;  %v772_v11 = vpop.f32.mrb[23].mxu0  ;;  %v900_v12 = vpop.f32.mrb[23].mxu1 }
 0x197   : > { %1791 = vst [vmem:[%s2431_s17 + $0x28] sm:$0xff] %v1655_v9   ;;  %1807 = vst [vmem:[%s2431_s17 + $0xa8] sm:$0xff] %v1735_v10  }
 0x19a   : > { %v775_v13 = vpop.f32.mrb[24].mxu0  ;;  %v903_v14 = vpop.f32.mrb[24].mxu1 }
 0x19b   : > { %v777_v15 = vpop.f32.mrb[25].mxu0  ;;  %v905_v16 = vpop.f32.mrb[25].mxu1 }
 0x19c   : > { %v778_v17 = vpop.f32.mrb[26].mxu0  ;;  %v906_v18 = vpop.f32.mrb[26].mxu1 }
 0x19d   : > { %v1660_v19 = vpack.c.bf16 %v778_v17, %v775_v13  ;;  %v1740_v20 = vpack.c.bf16 %v906_v18, %v903_v14  ;;  %v780_v21 = vpop.f32.mrb[27].mxu0  ;;  %v908_v22 = vpop.f32.mrb[27].mxu1 }
 0x19f   : > { %1792 = vst [vmem:[%s2431_s17 + $0x30] sm:$0xff] %v1660_v19   ;;  %1808 = vst [vmem:[%s2431_s17 + $0xb0] sm:$0xff] %v1740_v20  }
 0x1a2   : > { %v783_v23 = vpop.f32.mrb[28].mxu0  ;;  %v911_v24 = vpop.f32.mrb[28].mxu1 }
 0x1a3   : > { %v785_v25 = vpop.f32.mrb[29].mxu0  ;;  %v913_v26 = vpop.f32.mrb[29].mxu1 }
 0x1a4   : > { %v786_v27 = vpop.f32.mrb[30].mxu0  ;;  %v914_v28 = vpop.f32.mrb[30].mxu1 }
 0x1a5   : > { %v1665_v29 = vpack.c.bf16 %v786_v27, %v783_v23  ;;  %v1745_v30 = vpack.c.bf16 %v914_v28, %v911_v24  ;;  %v788_v31 = vpop.f32.mrb[31].mxu0  ;;  %v916_v32 = vpop.f32.mrb[31].mxu1 }
 0x1a7   : > { %1793 = vst [vmem:[%s2431_s17 + $0x38] sm:$0xff] %v1665_v29   ;;  %1809 = vst [vmem:[%s2431_s17 + $0xb8] sm:$0xff] %v1745_v30  }
 0x1aa   : > { %v791_v33 = vpop.f32.mrb[32].mxu0  ;;  %v919_v34 = vpop.f32.mrb[32].mxu1 }
 0x1ab   : > { %v793_v35 = vpop.f32.mrb[33].mxu0  ;;  %v921_v36 = vpop.f32.mrb[33].mxu1 }
 0x1ac   : > { %v794_v37 = vpop.f32.mrb[34].mxu0  ;;  %v922_v38 = vpop.f32.mrb[34].mxu1 }
 0x1ad   : > { %v1670_v39 = vpack.c.bf16 %v794_v37, %v791_v33  ;;  %v1750_v40 = vpack.c.bf16 %v922_v38, %v919_v34  ;;  %v796_v41 = vpop.f32.mrb[35].mxu0  ;;  %v924_v42 = vpop.f32.mrb[35].mxu1 }
 0x1af   : > { %1794 = vst [vmem:[%s2431_s17 + $0x40] sm:$0xff] %v1670_v39   ;;  %1810 = vst [vmem:[%s2431_s17 + $0xc0] sm:$0xff] %v1750_v40  }
 0x1b2   : > { %v799_v43 = vpop.f32.mrb[36].mxu0  ;;  %v927_v44 = vpop.f32.mrb[36].mxu1 }
 0x1b3   : > { %v801_v45 = vpop.f32.mrb[37].mxu0  ;;  %v929_v46 = vpop.f32.mrb[37].mxu1 }
 0x1b4   : > { %v802_v47 = vpop.f32.mrb[38].mxu0  ;;  %v930_v48 = vpop.f32.mrb[38].mxu1 }
 0x1b5   : > { %v1675_v49 = vpack.c.bf16 %v802_v47, %v799_v43  ;;  %v1755_v50 = vpack.c.bf16 %v930_v48, %v927_v44  ;;  %v804_v51 = vpop.f32.mrb[39].mxu0  ;;  %v932_v52 = vpop.f32.mrb[39].mxu1 }
 0x1b7   : > { %1795 = vst [vmem:[%s2431_s17 + $0x48] sm:$0xff] %v1675_v49   ;;  %1811 = vst [vmem:[%s2431_s17 + $0xc8] sm:$0xff] %v1755_v50  }
 0x1ba   : > { %v807_v53 = vpop.f32.mrb[40].mxu0  ;;  %v935_v54 = vpop.f32.mrb[40].mxu1 }
 0x1bb   : > { %v809_v55 = vpop.f32.mrb[41].mxu0  ;;  %v937_v56 = vpop.f32.mrb[41].mxu1 }
 0x1bc   : > { %v810_v57 = vpop.f32.mrb[42].mxu0  ;;  %v938_v58 = vpop.f32.mrb[42].mxu1 }
 0x1bd   : > { %v1680_v59 = vpack.c.bf16 %v810_v57, %v807_v53  ;;  %v1760_v60 = vpack.c.bf16 %v938_v58, %v935_v54  ;;  %v812_v61 = vpop.f32.mrb[43].mxu0  ;;  %v940_v62 = vpop.f32.mrb[43].mxu1 }
 0x1bf   : > { %1796 = vst [vmem:[%s2431_s17 + $0x50] sm:$0xff] %v1680_v59   ;;  %1812 = vst [vmem:[%s2431_s17 + $0xd0] sm:$0xff] %v1760_v60  }
 0x1c2   : > { %v815_v63 = vpop.f32.mrb[44].mxu0  ;;  %v943_v0 = vpop.f32.mrb[44].mxu1 }
 0x1c3   : > { %v817_v1 = vpop.f32.mrb[45].mxu0  ;;  %v945_v2 = vpop.f32.mrb[45].mxu1 }
 0x1c4   : > { %v818_v3 = vpop.f32.mrb[46].mxu0  ;;  %v946_v4 = vpop.f32.mrb[46].mxu1 }
 0x1c5   : > { %v1685_v5 = vpack.c.bf16 %v818_v3, %v815_v63  ;;  %v1765_v6 = vpack.c.bf16 %v946_v4, %v943_v0  ;;  %v820_v7 = vpop.f32.mrb[47].mxu0  ;;  %v948_v8 = vpop.f32.mrb[47].mxu1 }
 0x1c7   : > { %1797 = vst [vmem:[%s2431_s17 + $0x58] sm:$0xff] %v1685_v5   ;;  %1813 = vst [vmem:[%s2431_s17 + $0xd8] sm:$0xff] %v1765_v6  }
 0x1ca   : > { %v823_v9 = vpop.f32.mrb[48].mxu0  ;;  %v951_v10 = vpop.f32.mrb[48].mxu1 }
 0x1cb   : > { %v825_v11 = vpop.f32.mrb[49].mxu0  ;;  %v953_v12 = vpop.f32.mrb[49].mxu1 }
 0x1cc   : > { %v826_v13 = vpop.f32.mrb[50].mxu0  ;;  %v954_v14 = vpop.f32.mrb[50].mxu1 }
 0x1cd   : > { %v1690_v15 = vpack.c.bf16 %v826_v13, %v823_v9  ;;  %v1770_v16 = vpack.c.bf16 %v954_v14, %v951_v10  ;;  %v828_v17 = vpop.f32.mrb[51].mxu0  ;;  %v956_v18 = vpop.f32.mrb[51].mxu1 }
 0x1cf   : > { %1798 = vst [vmem:[%s2431_s17 + $0x60] sm:$0xff] %v1690_v15   ;;  %1814 = vst [vmem:[%s2431_s17 + $0xe0] sm:$0xff] %v1770_v16  }
 0x1d2   : > { %v831_v19 = vpop.f32.mrb[52].mxu0  ;;  %v959_v20 = vpop.f32.mrb[52].mxu1 }
 0x1d3   : > { %v833_v21 = vpop.f32.mrb[53].mxu0  ;;  %v961_v22 = vpop.f32.mrb[53].mxu1 }
 0x1d4   : > { %v834_v23 = vpop.f32.mrb[54].mxu0  ;;  %v962_v24 = vpop.f32.mrb[54].mxu1 }
 0x1d5   : > { %v1695_v25 = vpack.c.bf16 %v834_v23, %v831_v19  ;;  %v1775_v26 = vpack.c.bf16 %v962_v24, %v959_v20  ;;  %v836_v27 = vpop.f32.mrb[55].mxu0  ;;  %v964_v28 = vpop.f32.mrb[55].mxu1 }
 0x1d7   : > { %1799 = vst [vmem:[%s2431_s17 + $0x68] sm:$0xff] %v1695_v25   ;;  %1815 = vst [vmem:[%s2431_s17 + $0xe8] sm:$0xff] %v1775_v26  }
 0x1da   : > { %v839_v29 = vpop.f32.mrb[56].mxu0  ;;  %v967_v30 = vpop.f32.mrb[56].mxu1 }
 0x1db   : > { %v841_v31 = vpop.f32.mrb[57].mxu0  ;;  %v969_v32 = vpop.f32.mrb[57].mxu1 }
 0x1dc   : > { %v842_v33 = vpop.f32.mrb[58].mxu0  ;;  %v970_v34 = vpop.f32.mrb[58].mxu1 }
 0x1dd   : > { %v1700_v35 = vpack.c.bf16 %v842_v33, %v839_v29  ;;  %v1780_v36 = vpack.c.bf16 %v970_v34, %v967_v30  ;;  %v844_v37 = vpop.f32.mrb[59].mxu0  ;;  %v972_v38 = vpop.f32.mrb[59].mxu1 }
 0x1df   : > { %1800 = vst [vmem:[%s2431_s17 + $0x70] sm:$0xff] %v1700_v35   ;;  %1816 = vst [vmem:[%s2431_s17 + $0xf0] sm:$0xff] %v1780_v36  }
 0x1e2   : > { %v847_v39 = vpop.f32.mrb[60].mxu0  ;;  %v975_v40 = vpop.f32.mrb[60].mxu1 }
 0x1e3   : > { %v849_v41 = vpop.f32.mrb[61].mxu0  ;;  %v977_v42 = vpop.f32.mrb[61].mxu1 }
 0x1e4   : > { %v850_v43 = vpop.f32.mrb[62].mxu0  ;;  %v978_v44 = vpop.f32.mrb[62].mxu1 }
 0x1e5   : > { %v1705_v45 = vpack.c.bf16 %v850_v43, %v847_v39  ;;  %v1785_v46 = vpack.c.bf16 %v978_v44, %v975_v40  ;;  %v852_v47 = vpop.f32.mrb[63].mxu0  ;;  %v980_v48 = vpop.f32.mrb[63].mxu1 }
 0x1e7   : > { %1801 = vst [vmem:[%s2431_s17 + $0x78] sm:$0xff] %v1705_v45   ;;  %1817 = vst [vmem:[%s2431_s17 + $0xf8] sm:$0xff] %v1785_v46  }
 0x1e8   : > { %2097 = shalt.err (!%p2094_p7)
}
 0x1e9   : > { %s2098_s24 = scalar_lea.hbm %s2468_s4, 4096  ;;  %s2102_s26 = scalar_lea.hbm %s2518_s2, 8192 }
 0x1ea   : > { %p2099_p9 = scmp.ne.s32.totalorder %s2468_s4, %s2098_s24  ;;  %p2103_p5 = scmp.lt.u32.totalorder %s2468_s4, %s2518_s2 }
 0x1eb   : > { %p2104_p11 = scmp.lt.u32.totalorder %s2102_s26, %s2098_s24  ;;  %p2106_p4 = scmp.lt.u32.totalorder %s2098_s24, %s2468_s4 }
 0x1ec   : > { %p2100_p2 = pnand %p2099_p9, %p2272_p12 }
 0x1ed   : > { %p2105_p1 = por %p2104_p11, %p2103_p5 }
 0x1ee   : > { %p2101_p0 = pneg %p2100_p2 }
 0x1ef   : > { %p2107_p6 = por %p2106_p4, %p2105_p1 }
 0x1f1   : > { %p2108_p8 = pnand %p2107_p6, %p2101_p0 }
 0x1f3   : > { %2111 = shalt.err (!%p2108_p8)
}
 0x1f4   : > { %s2164_s3 = smov 64   ;;  %s2165_s15 = smov 4  }
 0x1f5   : > { %1856 = dma.vmem_to_hbm [thread:$0]  (%p2272_p12), %s2470_s22, 4096, %s2468_s4, %s1303_s13, %s2164_s3, %s2164_s3, %s2165_s15  }
 0x1f6 PF: > { %s1331_s17 = sand.u32 1, %s2142_s9   ;;  %p2533_p10 = scmp.ne.s32.totalorder %s2523_s16, 0 }
 0x1f7   : > { %p2534_p13 = scmp.ge.s32.totalorder %s2154_s12, 2  ;;  %s1332_s27 = scalar_lea.sflag [#allocation4], %s1331_s17 }
 0x1f9   : > { %p1867_p3 = pnand %p2534_p13, %p2533_p10 }
 0x1fb   : > { %2137 = dma.done.wait (!%p1867_p3), %s1332_s27, 4096  }
 0x1fc   : > { %2139 = vsyncadd (!%p1867_p3), %s1332_s27, 4294963200  ;;  %p16_p7 = scmp.ge.s32.totalorder %s2237_s21, 4   ;;  %s2535_s9 = smov %s2146_s10 }
 0x1fd   : > { %s2536_s10 = smov %s2150_s11  ;;  %s2537_s11 = smov %s2268_s8 }
 0x1fe   : > { %s2538_s12 = smov %s2237_s21  ;;  %18 = sbr.rel (!%p16_p7) target bundleno = 6 (0x6), region = 77 }
 0x205   :  { %1337 = vsyncpa [#allocation3], 1 }
 0x206   :  { %1339 = vsyncpa [#allocation3 + $0x1], 1 }
 0x207   :  { %1340 = vsyncpa [#allocation6], 1 }
 0x208   :  { %1341 = vsyncpa [#allocation4], 1 }
 0x209   :  { %1343 = vsyncpa [#allocation4 + $0x1], 1 }

</bundles_post_ra>
